<compile_context>
chip_gen: v7x
topology: tpu7x:2x2x1
jax: 0.10.0
libtpu: 0.0.40
codegen_flags: <defaults>
</compile_context>

<pallas_src>
import functools

import jax
import jax.numpy as jnp
from jax.experimental import pallas as pl
from jax.experimental.pallas import tpu as pltpu

_EPS = 1e-12  # matches torch F.normalize default eps
_MIB = 1024 * 1024


def _vmem_capacity_bytes():
    try:
        return int(pltpu.get_tpu_info().vmem_capacity_bytes)
    except Exception:
        return 64 * _MIB  # conservative (v7x-sized) fallback


def _sublane(dtype):
    itemsize = jnp.dtype(dtype).itemsize
    if itemsize >= 4:
        return 8          # f32
    if itemsize == 2:
        return 16         # bf16 packs 2 rows / sublane
    return 32             # int8 / fp8


def _round_up(n, m):
    return ((n + m - 1) // m) * m


# ----------------------------------------------------------------------------
# Narrow path: whole row fits in VMEM -> one pass, row-tiled only.
# ----------------------------------------------------------------------------
def _l2norm_kernel(x_ref, o_ref):
    # x_ref: (TB, C) tile of rows; normalize each row by its L2 norm.
    x = x_ref[...].astype(jnp.float32)                  # no-op cast if already f32
    ss = jnp.sum(x * x, axis=-1, keepdims=True)         # (TB, 1) f32
    # rsqrt lowers to the EUP (its own VLIW slot, essentially free) and is
    # mathematically identical to 1 / max(sqrt(ss), eps) for eps=1e-12 in f32.
    inv = jax.lax.rsqrt(jnp.maximum(ss, _EPS * _EPS))   # (TB, 1)
    o_ref[...] = (x * inv).astype(o_ref.dtype)


def _select_row_tile(B, C, dtype):
    """Pick the row tile for the narrow path.

    Returns None when even the minimum (sublane) row count blows the VMEM
    budget -> caller must use the feature-tiled wide path."""
    itemsize = jnp.dtype(dtype).itemsize
    sub = _sublane(dtype)
    vmem_cap = _vmem_capacity_bytes()

    # Resident VMEM per row of one block:
    #   input  (double-buffered): 2 * C * itemsize
    #   output (double-buffered): 2 * C * itemsize
    #   f32 working copy        : 4 * C   (live between reduction and scale)
    per_row = C * (4 * itemsize + 4)
    budget = vmem_cap // 4
    if sub * per_row > budget:
        return None

    # Per-block input byte target: ~4-8 MiB on v5e/v6e (128 MiB VMEM),
    # ~2-4 MiB on v7x (64 MiB VMEM).
    block_target = 3 * _MIB if vmem_cap <= 64 * _MIB else 6 * _MIB
    tb = min(budget // per_row, max(1, block_target // (C * itemsize)))
    tb = min(tb, _round_up(B, sub))
    tb = max(sub, (tb // sub) * sub)

    # Guarantee >=2 (up to 8) row blocks when there is enough data, so the
    # 'parallel' row axis shards across v7x's two TensorCores and the DMA
    # pipeline has more than one stage.
    if pl.cdiv(B, tb) < 2:
        total_bytes = B * C * itemsize
        want = min(8, B // sub, max(2, total_bytes // _MIB))
        if want >= 2:
            tb_split = _round_up(pl.cdiv(B, want), sub)
            tb = max(sub, min(tb, tb_split))
    return tb


def _l2norm_rows(x, tb):
    B, C = x.shape
    vmem_cap = _vmem_capacity_bytes()
    return pl.pallas_call(
        _l2norm_kernel,
        out_shape=jax.ShapeDtypeStruct((B, C), x.dtype),
        grid_spec=pltpu.PrefetchScalarGridSpec(
            num_scalar_prefetch=0,
            grid=(pl.cdiv(B, tb),),
            in_specs=[pl.BlockSpec((tb, C), lambda i: (i, 0))],
            out_specs=pl.BlockSpec((tb, C), lambda i: (i, 0)),
        ),
        compiler_params=pltpu.CompilerParams(
            dimension_semantics=("parallel",),
            vmem_limit_bytes=int(min(vmem_cap * 3 // 4, 100 * _MIB)),
        ),
    )(x)


# ----------------------------------------------------------------------------
# Wide path: rows too wide for VMEM -> two passes, feature-tiled.
# ----------------------------------------------------------------------------
def _ss_kernel(x_ref, ss_ref, *, C, tc, mask_cols):
    j = pl.program_id(1)

    @pl.when(j == 0)
    def _():
        ss_ref[...] = jnp.zeros_like(ss_ref)

    x = x_ref[...].astype(jnp.float32)
    if mask_cols:
        # Last feature block is partial: zero the out-of-bounds columns so the
        # unspecified OOB data never enters the reduction.
        col = j * tc + jax.lax.broadcasted_iota(jnp.int32, x.shape, 1)
        x = jnp.where(col < C, x, 0.0)
    ss_ref[...] += jnp.sum(x * x, axis=-1, keepdims=True)


def _scale_kernel(x_ref, ss_ref, o_ref):
    inv = jax.lax.rsqrt(jnp.maximum(ss_ref[...], _EPS * _EPS))  # (TB, 1) f32
    o_ref[...] = (x_ref[...].astype(jnp.float32) * inv).astype(o_ref.dtype)


def _select_wide_tiles(B, C, dtype):
    itemsize = jnp.dtype(dtype).itemsize
    sub = _sublane(dtype)
    vmem_cap = _vmem_capacity_bytes()
    budget = vmem_cap // 4
    tb = min(_round_up(B, sub), 8 * sub)
    per_col = tb * (4 * itemsize + 4)
    tc = max(128, (min(budget // per_col, C) // 128) * 128)
    return tb, tc


def _l2norm_wide(x, tb=None, tc=None):
    B, C = x.shape
    if tb is None or tc is None:
        tb, tc = _select_wide_tiles(B, C, x.dtype)
    nb, nc = pl.cdiv(B, tb), pl.cdiv(C, tc)
    vmem_cap = _vmem_capacity_bytes()
    vmem_limit = int(min(vmem_cap * 3 // 4, 100 * _MIB))

    # Pass 1: per-row sum of squares, accumulated across feature tiles.
    ss = pl.pallas_call(
        functools.partial(_ss_kernel, C=C, tc=tc, mask_cols=(C % tc != 0)),
        out_shape=jax.ShapeDtypeStruct((B, 1), jnp.float32),
        grid_spec=pltpu.PrefetchScalarGridSpec(
            num_scalar_prefetch=0,
            grid=(nb, nc),
            in_specs=[pl.BlockSpec((tb, tc), lambda i, j: (i, j))],
            out_specs=pl.BlockSpec((tb, 1), lambda i, j: (i, 0)),
        ),
        compiler_params=pltpu.CompilerParams(
            dimension_semantics=("parallel", "arbitrary"),
            vmem_limit_bytes=vmem_limit,
        ),
    )(x)

    # Pass 2: scale each feature tile by its row's inverse norm.
    return pl.pallas_call(
        _scale_kernel,
        out_shape=jax.ShapeDtypeStruct((B, C), x.dtype),
        grid_spec=pltpu.PrefetchScalarGridSpec(
            num_scalar_prefetch=0,
            grid=(nb, nc),
            in_specs=[pl.BlockSpec((tb, tc), lambda i, j: (i, j)),
                      pl.BlockSpec((tb, 1), lambda i, j: (i, 0))],
            out_specs=pl.BlockSpec((tb, tc), lambda i, j: (i, j)),
        ),
        compiler_params=pltpu.CompilerParams(
            dimension_semantics=("parallel", "parallel"),
            vmem_limit_bytes=vmem_limit,
        ),
    )(x, ss)


# ----------------------------------------------------------------------------
# Public entry point (== L2Norm.forward).
# ----------------------------------------------------------------------------
def l2norm(x):
    """L2-normalize each row of a [B, C] array (== F.normalize(x, p=2, dim=-1))."""
    assert x.ndim == 2, "the input tensor of L2Norm must be the shape of [B, C]"
    B, C = x.shape
    tb = _select_row_tile(B, C, x.dtype)
    if tb is None:
        # Rows too wide to keep whole in VMEM: feature-tiled two-pass path.
        return _l2norm_wide(x)
    return _l2norm_rows(x, tb)


if __name__ == "__main__":
    key = jax.random.PRNGKey(0)

    def ref_l2norm(v):
        return v / jnp.maximum(jnp.linalg.norm(v, axis=-1, keepdims=True), _EPS)

    # Small [B, C] input consistent with the module; C not a multiple of 128,
    # exercising the masked partial-lane store path (no pad/slice round-trip).
    B, C = 8, 32
    x = jax.random.normal(key, (B, C), dtype=jnp.float32)
    out = jax.block_until_ready(l2norm(x))
    assert out.shape == (B, C)
    assert jnp.allclose(out, ref_l2norm(x), atol=1e-5, rtol=1e-5)

    # Exercise the wide (feature-tiled, two-pass) path with forced small tiles
    # and shapes that are non-divisible on both axes.
    B2, C2 = 13, 200
    x2 = jax.random.normal(jax.random.PRNGKey(0), (B2, C2), dtype=jnp.float32)
    out2 = jax.block_until_ready(_l2norm_wide(x2, tb=8, tc=128))
    assert out2.shape == (B2, C2)
    assert jnp.allclose(out2, ref_l2norm(x2), atol=1e-5, rtol=1e-5)

    print("KERNEL_OK")
</pallas_src>

<mosaic_0001>
module attributes {stable_mosaic.version = 11 : i64} {
  func.func @_l2norm_kernel(%arg0: i32, %arg1: memref<8x32xf32, #tpu.memory_space<vmem>>, %arg2: memref<8x32xf32, #tpu.memory_space<vmem>>) attributes {dimension_semantics = [#tpu.dimension_semantics<parallel>], iteration_bounds = array<i64: 1>, scalar_prefetch = 0 : i64, scratch_operands = 0 : i64, tpu.core_type = #tpu.core_type<tc>, window_params = [{transform_indices = @transform_0, window_bounds = array<i64: 8, 32>}, {transform_indices = @transform_1, window_bounds = array<i64: 8, 32>}]} {
    %c0 = arith.constant 0 : index
    %c0_0 = arith.constant 0 : index
    %0 = vector.load %arg1[%c0, %c0_0] : memref<8x32xf32, #tpu.memory_space<vmem>>, vector<8x32xf32>
    %1 = arith.mulf %0, %0 : vector<8x32xf32>
    %cst = arith.constant dense<0.000000e+00> : vector<8xf32>
    %2 = vector.multi_reduction <add>, %1, %cst [1] : vector<8x32xf32> to vector<8xf32>
    %3 = vector.shape_cast %2 : vector<8xf32> to vector<8x1xf32>
    %cst_1 = arith.constant 1.000000e-24 : f32
    %4 = vector.broadcast %cst_1 : f32 to vector<8x1xf32>
    %5 = arith.maximumf %3, %4 : vector<8x1xf32>
    %6 = math.rsqrt %5 : vector<8x1xf32>
    %7 = vector.broadcast %6 : vector<8x1xf32> to vector<8x32xf32>
    %8 = arith.mulf %0, %7 : vector<8x32xf32>
    %c0_2 = arith.constant 0 : index
    %c0_3 = arith.constant 0 : index
    %9 = vector.load %arg2[%c0_2, %c0_3] : memref<8x32xf32, #tpu.memory_space<vmem>>, vector<8x32xf32>
    tpu.vector_store %arg2[%c0_2, %c0_3], %8 {strides = array<i32>} : memref<8x32xf32, #tpu.memory_space<vmem>>, vector<8x32xf32>,
    return
  }
  func.func @transform_0(%arg0: i32) -> (i32, i32) {
    %c0_i32 = arith.constant 0 : i32
    %c0_i32_0 = arith.constant 0 : i32
    return %arg0, %c0_i32 : i32, i32
  }
  func.func @transform_1(%arg0: i32) -> (i32, i32) {
    %c0_i32 = arith.constant 0 : i32
    %c0_i32_0 = arith.constant 0 : i32
    return %arg0, %c0_i32 : i32, i32
  }
}

</mosaic_0001>

<bundles_post_ra>
// kernel: tpu_custom_call.1
= control target key start
LH: loop header
LB: loop body
LE: loop exit
PB: predicated region body
PF: predicated region fallthrough
CT: control target
= control target key end

     0   :  { %6 = vsyncpa [#allocation3], 0  ;;  %s134_s0 = inlined_call_operand.hbm [shape: f32[8,32], index: 0, kind: input, shape index: {}]   ;;  %s135_s1 = inlined_call_operand.hbm [shape: f32[8,32], index: 1, kind: output, shape index: {}]  }
   0x1   :  { %7 = vsyncpa [#allocation4], 0  ;;  %s98_s6 = smov [#allocation2]   ;;  %s50_s10 = scalar_lea.hbm %s134_s0, 128 }
   0x2   :  { %s14_s7 = sshll.u32 %s98_s6, 4  ;;  %p51_p0 = scmp.ne.s32.totalorder %s134_s0, %s50_s10  ;;  %s15_s7 = int_to_ptr.vmem [resolvable:$true] %s14_s7 }
   0x3   :  { %p54_p1 = scmp.lt.u32.totalorder %s50_s10, %s134_s0 }
   0x5   :  { %p56_p2 = pnand %p54_p1, %p51_p0 }
   0x7   :  { %59 = shalt.err (!%p56_p2)
}
   0x8   :  { %s60_s15 = scalar_lea.vmem %s15_s7, 128  ;;  %p65_p4 = scmp.lt.s32.totalorder %s15_s7, %s15_s7 }
   0x9   :  { %p61_p3 = scmp.ne.s32.totalorder %s15_s7, %s60_s15  ;;  %p66_p5 = scmp.lt.s32.totalorder %s60_s15, %s60_s15 }
   0xb   :  { %p67_p6 = por %p66_p5, %p65_p4 }
   0xd   :  { %p68_p7 = pnand %p67_p6, %p61_p3 }
   0xf   :  { %71 = shalt.err (!%p68_p7)
}
  0x10   :  { %17 = dma.hbm_to_vmem [thread:$0]  %s134_s0, 128, %s15_s7, [#allocation3]  }
  0x11   :  { %94 = dma.done.wait [#allocation3], 128  }
  0x12   :  { %95 = vsyncadd [#allocation3], 4294967168  ;;  %v21_v0 = vld [vmem:[#allocation2] sm:$0xff]  ;;  %vm23_vm0 = vcmask 261120   ;;  %s99_s18 = smov [#allocation5]  }
  0x13   :  { %v22_v1 = vmul.f32 %v21_v0, %v21_v0  ;;  %s37_s19 = sshll.u32 %s99_s18, 4  ;;  %s38_s19 = int_to_ptr.vmem [resolvable:$true] %s37_s19 }
  0x14   :  { %s72_s20 = scalar_lea.vmem %s38_s19, 128  ;;  %p77_p9 = scmp.lt.s32.totalorder %s38_s19, %s38_s19 }
  0x15   :  { %v24_v2 = vsel %vm23_vm0, %v22_v1, 0.0  ;;  %p73_p8 = scmp.ne.s32.totalorder %s38_s19, %s72_s20  ;;  %p78_p10 = scmp.lt.s32.totalorder %s72_s20, %s72_s20 }
  0x16   :  { %25 = vadd.xlane.f32.xlu0 %v24_v2 }
  0x17   :  { %p79_p11 = por %p78_p10, %p77_p9 }
  0x19   :  { %p80_p12 = pnand %p79_p11, %p73_p8 }
  0xa3   :  { %v26_v3 = vpop.xlane.xlu0 %25 }
  0xa4   :  { %v27_v4 = vmax.f32 %v26_v3, 1e-24 }
  0xa6   :  { %48 = vrsqrt.f32 %v27_v4 }
  0xb0   :  { %v49_v5 = vpop.eup %48 }
  0xb1   :  { %v29_v6 = vmul.f32 %v49_v5, %v21_v0 }
  0xb3   :  { %30 = vst.msk [vmem:[#allocation5] sm:$0xff] %vm23_vm0, %v29_v6 }
  0xb4   :  { %83 = shalt.err (!%p80_p12)
}
  0xb5   :  { %s84_s22 = scalar_lea.hbm %s135_s1, 128 }
  0xb6   :  { %p85_p13 = scmp.ne.s32.totalorder %s135_s1, %s84_s22  ;;  %p88_p0 = scmp.lt.u32.totalorder %s84_s22, %s135_s1 }
  0xb8   :  { %p90_p1 = pnand %p88_p0, %p85_p13 }
  0xba   :  { %93 = shalt.err (!%p90_p1)
}
  0xbb   :  { %40 = dma.vmem_to_hbm [thread:$0]  %s38_s19, 128, %s135_s1, [#allocation4]  }
  0xbc   :  { %96 = dma.done.wait [#allocation4], 128  }
  0xbd   :  { %97 = vsyncadd [#allocation4], 4294967168 }
  0xbe   :  { %44 = vsyncpa [#allocation3], 1 }
  0xbf   :  { %45 = vsyncpa [#allocation4], 1 }

</bundles_post_ra>
